<compile_context>
chip_gen: v6e
topology: v6e:2x2x1
jax: 0.10.0
libtpu: 0.0.40
codegen_flags: <defaults>
</compile_context>

<pallas_src>
import functools

import jax
import jax.numpy as jnp
from jax import lax
from jax.experimental import pallas as pl
from jax.experimental.pallas import tpu as pltpu


def _leaky_relu(x, slope=0.2):
    return jnp.where(x > 0, x, slope * x)


def _mod(x, d):
    """x % d; bit-and when d is a power of two (no HW integer div/mod)."""
    if d & (d - 1) == 0:
        return jnp.bitwise_and(x, d - 1)
    return x % d


def _div(x, d):
    """x // d; shift when d is a power of two."""
    if d & (d - 1) == 0:
        return jnp.right_shift(x, d.bit_length() - 1)
    return x // d


def _resconv_kernel(*refs, H, W, nb, cin, cm, cout, res_bool, use_skip):
    if use_skip:
        (x_ref, w1_ref, b1_ref, w2_ref, b2_ref, w3f_ref, b3_ref,
         wsk_ref, bsk_ref, o_ref) = refs
    else:
        (x_ref, w1_ref, b1_ref, w2_ref, b2_ref, w3f_ref, b3_ref,
         o_ref) = refs

    HW = H * W
    HWt = nb * HW          # nb images of this block stacked on the lane axis

    # ---- gather the nb images onto the lane axis ---------------------------
    if nb == 1:
        x = x_ref[0]                                           # (Cin, HW) f32
    else:
        x = jnp.concatenate([x_ref[i] for i in range(nb)], axis=-1)
    x_bf = x.astype(jnp.bfloat16)

    # ---- conv1 / conv2: 1x1 convs as channel matmuls (bf16 MXU, f32 acc) ---
    h1 = _leaky_relu(
        jnp.dot(w1_ref[...], x_bf, preferred_element_type=jnp.float32)
        + b1_ref[...])                                         # (Cm, HWt) f32
    h2 = _leaky_relu(
        jnp.dot(w2_ref[...], h1.astype(jnp.bfloat16),
                preferred_element_type=jnp.float32)
        + b2_ref[...])                                         # (Cm, HWt) f32

    # ---- conv3: 3x3 SAME conv as ONE fused (Cout, 9*Cm)@(9*Cm, HWt) matmul -
    # Border masks from a single (1, HWt) iota (bit ops when H/W are pow2);
    # they also zero positions where a lane-roll crosses an image boundary
    # inside the nb-image lane stack.
    pos = lax.broadcasted_iota(jnp.int32, (1, HWt), 1)
    col = _mod(pos, W)
    row = _mod(_div(pos, W), H)
    not_l = col > 0
    not_r = col < (W - 1)
    not_t = row > 0
    not_b = row < (H - 1)

    taps = []
    for k in range(9):
        dy, dx = k // 3 - 1, k % 3 - 1
        shift = (-(dy * W + dx)) % HWt        # rolled[p] = h2[p + dy*W + dx]
        tap = h2 if shift == 0 else pltpu.roll(h2, shift, axis=1)
        conds = []
        if dx == 1:
            conds.append(not_r)
        elif dx == -1:
            conds.append(not_l)
        if dy == 1:
            conds.append(not_b)
        elif dy == -1:
            conds.append(not_t)
        if conds:
            valid = conds[0]
            for c in conds[1:]:
                valid = jnp.logical_and(valid, c)
            tap = jnp.where(valid, tap, 0.0)
        taps.append(tap)                                       # (Cm, HWt) f32

    # Sublane concat (f32, 8-row aligned pieces) then one cast to bf16.
    tap_stack = jnp.concatenate(taps, axis=0).astype(jnp.bfloat16)  # (9Cm,HWt)
    r = (jnp.dot(w3f_ref[...], tap_stack, preferred_element_type=jnp.float32)
         + b3_ref[...])                                        # (Cout, HWt)
    residual = _leaky_relu(r)

    # ---- skip connection ----------------------------------------------------
    if res_bool:
        if use_skip:      # Cin != Cout -> 1x1 skip conv
            skip = (jnp.dot(wsk_ref[...], x_bf,
                            preferred_element_type=jnp.float32)
                    + bsk_ref[...])
        else:             # Cin == Cout -> identity skip (kept f32, exact)
            skip = x
        out = skip + residual
    else:
        out = residual

    # ---- scatter the nb images back out -------------------------------------
    if nb == 1:
        o_ref[0] = out.astype(o_ref.dtype)
    else:
        for i in range(nb):
            o_ref[i] = out[:, i * HW:(i + 1) * HW].astype(o_ref.dtype)


def res_conv_block(x_nchw, params, *, res_bool, images_per_block=None):
    """ResConvBlock forward. Input/output are NCHW (PyTorch layout)."""
    N, cin, H, W = x_nchw.shape
    HW = H * W
    cm = params["w1"].shape[0]
    cout = params["w3"].shape[1]
    use_skip = bool(res_bool) and (cin != cout)

    # Images per grid step: fatter blocks amortize the ~0.35us/step overhead
    # on single-TC v5e/v6e; the default keeps >=2 grid blocks so v7x's two
    # TensorCores both get work on the "parallel" batch axis.
    if images_per_block is None:
        target = max(1, N // 2)
        nb = next(d for d in range(target, 0, -1) if N % d == 0)
    else:
        nb = images_per_block
        assert N % nb == 0, "batch must be divisible by images_per_block"

    # Free reshape: stays NCHW, just flattens spatial onto the lane axis.
    x = x_nchw.reshape(N, cin, HW)

    # Host-side weight prep (tiny, outside the kernel):
    #   * fuse the 9 conv3 taps into a single (Cout, 9*Cm) matrix
    #   * cast matmul weights to bf16 (biases stay f32; adds are f32 in-kernel)
    bf16 = jnp.bfloat16
    w1 = params["w1"].astype(bf16)
    w2 = params["w2"].astype(bf16)
    w3f = jnp.transpose(params["w3"], (1, 0, 2)).reshape(cout, 9 * cm)
    w3f = w3f.astype(bf16)

    kernel = functools.partial(
        _resconv_kernel, H=H, W=W, nb=nb, cin=cin, cm=cm, cout=cout,
        res_bool=bool(res_bool), use_skip=use_skip)

    def full(shape):
        return pl.BlockSpec(shape, lambda n: (0,) * len(shape))

    in_specs = [
        pl.BlockSpec((nb, cin, HW), lambda n: (n, 0, 0)),   # x
        full((cm, cin)), full((cm, 1)),                     # w1, b1
        full((cm, cm)), full((cm, 1)),                      # w2, b2
        full((cout, 9 * cm)), full((cout, 1)),              # w3 (fused), b3
    ]
    args = [x, w1, params["b1"], w2, params["b2"], w3f, params["b3"]]
    if use_skip:  # only DMA the skip weights when they are actually used
        in_specs += [full((cout, cin)), full((cout, 1))]
        args += [params["w_skip"].astype(bf16), params["b_skip"]]

    out = pl.pallas_call(
        kernel,
        out_shape=jax.ShapeDtypeStruct((N, cout, HW), jnp.float32),
        grid_spec=pltpu.PrefetchScalarGridSpec(
            num_scalar_prefetch=0,
            grid=(N // nb,),
            in_specs=in_specs,
            out_specs=pl.BlockSpec((nb, cout, HW), lambda n: (n, 0, 0)),
        ),
        compiler_params=pltpu.CompilerParams(
            dimension_semantics=("parallel",),
            vmem_limit_bytes=32 * 1024 * 1024),  # explicit (> v5e's 16 MiB default)
    )(*args)

    # TODO(synk): for GAN-scale H/W (e.g. 256x256, Cm>=64) add an H-tile grid
    # axis with a 1-row halo and bf16 activations, re-deriving the tile per
    # chip (v7x VMEM is 64 MiB, not 128) and keeping tile x double-buffering
    # under the scoped limit.
    # TODO(synk): Cout=6 leaves 2/8 output sublanes dead; padding channels to 8
    # would remove partial sublane stores but needs the model to accept it.
    return out.reshape(N, cout, H, W)


def _reference(x_nchw, params, *, res_bool):
    """Pure-JAX f32 reference (lax convs, NCHW) for a correctness check."""
    cin = x_nchw.shape[1]
    cm = params["w1"].shape[0]
    cout = params["w3"].shape[1]
    dn = ("NCHW", "OIHW", "NCHW")

    def conv(inp, w_oihw, b, pad):
        y = lax.conv_general_dilated(inp, w_oihw, (1, 1), pad,
                                     dimension_numbers=dn)
        return y + b.reshape(1, -1, 1, 1)

    h1 = _leaky_relu(conv(x_nchw, params["w1"].reshape(cm, cin, 1, 1),
                          params["b1"], "VALID"))
    h2 = _leaky_relu(conv(h1, params["w2"].reshape(cm, cm, 1, 1),
                          params["b2"], "VALID"))
    # w3 stored as (9, Cout, Cm), tap-major over (ky, kx) -> OIHW (Cout,Cm,3,3)
    w3_oihw = jnp.transpose(params["w3"].reshape(3, 3, cout, cm), (2, 3, 0, 1))
    r = _leaky_relu(conv(h2, w3_oihw, params["b3"], ((1, 1), (1, 1))))
    if res_bool:
        if cin != cout:
            skip = conv(x_nchw, params["w_skip"].reshape(cout, cin, 1, 1),
                        params["b_skip"], "VALID")
        else:
            skip = x_nchw
        out = skip + r
    else:
        out = r
    return out


def init_params(key, cin, cm, cout):
    ks = jax.random.split(key, 8)
    s = 0.1
    return {
        # weights stored (out_channels, in_channels) like PyTorch Conv2d
        "w1": s * jax.random.normal(ks[0], (cm, cin), jnp.float32),
        "b1": s * jax.random.normal(ks[1], (cm, 1), jnp.float32),
        "w2": s * jax.random.normal(ks[2], (cm, cm), jnp.float32),
        "b2": s * jax.random.normal(ks[3], (cm, 1), jnp.float32),
        # conv3 weights: (9, Cout, Cm), taps flattened over (ky, kx)
        "w3": s * jax.random.normal(ks[4], (9, cout, cm), jnp.float32),
        "b3": s * jax.random.normal(ks[5], (cout, 1), jnp.float32),
        "w_skip": s * jax.random.normal(ks[6], (cout, cin), jnp.float32),
        "b_skip": s * jax.random.normal(ks[7], (cout, 1), jnp.float32),
    }


if __name__ == "__main__":
    key = jax.random.PRNGKey(0)
    k_x, k_p = jax.random.split(key)

    # N=4 exercises the nb=2 batch-merging path (grid of 2 "parallel" blocks).
    N, Cin, Cm, Cout, H, W = 4, 4, 8, 6, 16, 16
    res_bool = True  # Cin != Cout -> exercises the cnn_skip path

    x = jax.random.normal(k_x, (N, Cin, H, W), jnp.float32)  # NCHW like PyTorch
    params = init_params(k_p, Cin, Cm, Cout)

    out = res_conv_block(x, params, res_bool=res_bool)
    out = jax.block_until_ready(out)

    ref = _reference(x, params, res_bool=res_bool)
    assert out.shape == (N, Cout, H, W)
    # bf16 MXU operands (f32 accumulate) vs f32 reference -> loosened tolerance.
    assert jnp.allclose(out, ref, atol=5e-2, rtol=5e-2), "mismatch vs reference"

    print("KERNEL_OK")
</pallas_src>

<mosaic_0001>
module attributes {stable_mosaic.version = 11 : i64} {
  func.func @_resconv_kernel(%arg0: i32, %arg1: memref<2x4x256xf32, #tpu.memory_space<vmem>>, %arg2: memref<8x4xbf16, #tpu.memory_space<vmem>>, %arg3: memref<8x1xf32, #tpu.memory_space<vmem>>, %arg4: memref<8x8xbf16, #tpu.memory_space<vmem>>, %arg5: memref<8x1xf32, #tpu.memory_space<vmem>>, %arg6: memref<6x72xbf16, #tpu.memory_space<vmem>>, %arg7: memref<6x1xf32, #tpu.memory_space<vmem>>, %arg8: memref<6x4xbf16, #tpu.memory_space<vmem>>, %arg9: memref<6x1xf32, #tpu.memory_space<vmem>>, %arg10: memref<2x6x256xf32, #tpu.memory_space<vmem>>) attributes {dimension_semantics = [#tpu.dimension_semantics<parallel>], iteration_bounds = array<i64: 2>, scalar_prefetch = 0 : i64, scratch_operands = 0 : i64, tpu.core_type = #tpu.core_type<tc>, window_params = [{transform_indices = @transform_0, window_bounds = array<i64: 2, 4, 256>}, {pipeline_mode = #tpu.pipeline_mode<synchronous>, transform_indices = @transform_1, window_bounds = array<i64: 8, 4>}, {pipeline_mode = #tpu.pipeline_mode<synchronous>, transform_indices = @transform_2, window_bounds = array<i64: 8, 1>}, {pipeline_mode = #tpu.pipeline_mode<synchronous>, transform_indices = @transform_3, window_bounds = array<i64: 8, 8>}, {pipeline_mode = #tpu.pipeline_mode<synchronous>, transform_indices = @transform_4, window_bounds = array<i64: 8, 1>}, {pipeline_mode = #tpu.pipeline_mode<synchronous>, transform_indices = @transform_5, window_bounds = array<i64: 6, 72>}, {pipeline_mode = #tpu.pipeline_mode<synchronous>, transform_indices = @transform_6, window_bounds = array<i64: 6, 1>}, {pipeline_mode = #tpu.pipeline_mode<synchronous>, transform_indices = @transform_7, window_bounds = array<i64: 6, 4>}, {pipeline_mode = #tpu.pipeline_mode<synchronous>, transform_indices = @transform_8, window_bounds = array<i64: 6, 1>}, {transform_indices = @transform_9, window_bounds = array<i64: 2, 6, 256>}]} {
    %c0 = arith.constant 0 : index
    %c0_0 = arith.constant 0 : index
    %c0_1 = arith.constant 0 : index
    %0 = vector.load %arg1[%c0, %c0_0, %c0_1] : memref<2x4x256xf32, #tpu.memory_space<vmem>>, vector<1x4x256xf32>
    %1 = vector.shape_cast %0 : vector<1x4x256xf32> to vector<4x256xf32>
    %c1 = arith.constant 1 : index
    %c0_2 = arith.constant 0 : index
    %c0_3 = arith.constant 0 : index
    %2 = vector.load %arg1[%c1, %c0_2, %c0_3] : memref<2x4x256xf32, #tpu.memory_space<vmem>>, vector<1x4x256xf32>
    %3 = vector.shape_cast %2 : vector<1x4x256xf32> to vector<4x256xf32>
    %4 = tpu.concatenate %1, %3 in 1 : vector<4x256xf32>, vector<4x256xf32> -> vector<4x512xf32>
    %5 = arith.truncf %4 : vector<4x512xf32> to vector<4x512xbf16>
    %c0_4 = arith.constant 0 : index
    %c0_5 = arith.constant 0 : index
    %6 = vector.load %arg2[%c0_4, %c0_5] : memref<8x4xbf16, #tpu.memory_space<vmem>>, vector<8x4xbf16>
    %cst = arith.constant dense<0.000000e+00> : vector<8x512xf32>
    %7 = tpu.matmul %6, %5, %cst {dimension_numbers = #tpu.dot_dimension_numbers<[1], [0], [0], [1], [0, 0, 1, 1], [], []>} : vector<8x4xbf16>, vector<4x512xbf16>, vector<8x512xf32> -> vector<8x512xf32>
    %c0_6 = arith.constant 0 : index
    %c0_7 = arith.constant 0 : index
    %8 = vector.load %arg3[%c0_6, %c0_7] : memref<8x1xf32, #tpu.memory_space<vmem>>, vector<8x1xf32>
    %9 = vector.broadcast %8 : vector<8x1xf32> to vector<8x512xf32>
    %10 = arith.addf %7, %9 : vector<8x512xf32>
    %cst_8 = arith.constant 0.000000e+00 : f32
    %11 = vector.broadcast %cst_8 : f32 to vector<8x512xf32>
    %12 = arith.cmpf ogt, %10, %11 : vector<8x512xf32>
    %cst_9 = arith.constant 2.000000e-01 : f32
    %13 = vector.broadcast %cst_9 : f32 to vector<8x512xf32>
    %14 = arith.mulf %13, %10 : vector<8x512xf32>
    %15 = arith.select %12, %10, %14 : vector<8x512xi1>, vector<8x512xf32>
    %c0_10 = arith.constant 0 : index
    %c0_11 = arith.constant 0 : index
    %16 = vector.load %arg4[%c0_10, %c0_11] : memref<8x8xbf16, #tpu.memory_space<vmem>>, vector<8x8xbf16>
    %17 = arith.truncf %15 : vector<8x512xf32> to vector<8x512xbf16>
    %cst_12 = arith.constant dense<0.000000e+00> : vector<8x512xf32>
    %18 = tpu.matmul %16, %17, %cst_12 {dimension_numbers = #tpu.dot_dimension_numbers<[1], [0], [0], [1], [0, 0, 1, 1], [], []>} : vector<8x8xbf16>, vector<8x512xbf16>, vector<8x512xf32> -> vector<8x512xf32>
    %c0_13 = arith.constant 0 : index
    %c0_14 = arith.constant 0 : index
    %19 = vector.load %arg5[%c0_13, %c0_14] : memref<8x1xf32, #tpu.memory_space<vmem>>, vector<8x1xf32>
    %20 = vector.broadcast %19 : vector<8x1xf32> to vector<8x512xf32>
    %21 = arith.addf %18, %20 : vector<8x512xf32>
    %cst_15 = arith.constant 0.000000e+00 : f32
    %22 = vector.broadcast %cst_15 : f32 to vector<8x512xf32>
    %23 = arith.cmpf ogt, %21, %22 : vector<8x512xf32>
    %cst_16 = arith.constant 2.000000e-01 : f32
    %24 = vector.broadcast %cst_16 : f32 to vector<8x512xf32>
    %25 = arith.mulf %24, %21 : vector<8x512xf32>
    %26 = arith.select %23, %21, %25 : vector<8x512xi1>, vector<8x512xf32>
    %27 = tpu.iota {dimensions = array<i32: 1>} : vector<1x512xi32>
    %c15_i32 = arith.constant 15 : i32
    %28 = vector.broadcast %c15_i32 : i32 to vector<1x512xi32>
    %29 = arith.andi %27, %28 : vector<1x512xi32>
    %c4_i32 = arith.constant 4 : i32
    %30 = vector.broadcast %c4_i32 : i32 to vector<1x512xi32>
    %31 = arith.shrsi %27, %30 : vector<1x512xi32>
    %c15_i32_17 = arith.constant 15 : i32
    %32 = vector.broadcast %c15_i32_17 : i32 to vector<1x512xi32>
    %33 = arith.andi %31, %32 : vector<1x512xi32>
    %c0_i32 = arith.constant 0 : i32
    %34 = vector.broadcast %c0_i32 : i32 to vector<1x512xi32>
    %35 = arith.cmpi sgt, %29, %34 : vector<1x512xi32>
    %c15_i32_18 = arith.constant 15 : i32
    %36 = vector.broadcast %c15_i32_18 : i32 to vector<1x512xi32>
    %37 = arith.cmpi slt, %29, %36 : vector<1x512xi32>
    %c0_i32_19 = arith.constant 0 : i32
    %38 = vector.broadcast %c0_i32_19 : i32 to vector<1x512xi32>
    %39 = arith.cmpi sgt, %33, %38 : vector<1x512xi32>
    %c15_i32_20 = arith.constant 15 : i32
    %40 = vector.broadcast %c15_i32_20 : i32 to vector<1x512xi32>
    %41 = arith.cmpi slt, %33, %40 : vector<1x512xi32>
    %c17_i32 = arith.constant 17 : i32
    %42 = tpu.dynamic_rotate %26 by %c17_i32 dim 1 : vector<8x512xf32>, i32 -> vector<8x512xf32>
    %43 = arith.andi %35, %39 : vector<1x512xi1>
    %cst_21 = arith.constant 0.000000e+00 : f32
    %44 = vector.shape_cast %43 : vector<1x512xi1> to vector<1x512xi1>
    %45 = vector.broadcast %44 : vector<1x512xi1> to vector<8x512xi1>
    %46 = vector.broadcast %cst_21 : f32 to vector<8x512xf32>
    %47 = arith.select %45, %42, %46 : vector<8x512xi1>, vector<8x512xf32>
    %c16_i32 = arith.constant 16 : i32
    %48 = tpu.dynamic_rotate %26 by %c16_i32 dim 1 : vector<8x512xf32>, i32 -> vector<8x512xf32>
    %cst_22 = arith.constant 0.000000e+00 : f32
    %49 = vector.shape_cast %39 : vector<1x512xi1> to vector<1x512xi1>
    %50 = vector.broadcast %49 : vector<1x512xi1> to vector<8x512xi1>
    %51 = vector.broadcast %cst_22 : f32 to vector<8x512xf32>
    %52 = arith.select %50, %48, %51 : vector<8x512xi1>, vector<8x512xf32>
    %c15_i32_23 = arith.constant 15 : i32
    %53 = tpu.dynamic_rotate %26 by %c15_i32_23 dim 1 : vector<8x512xf32>, i32 -> vector<8x512xf32>
    %54 = arith.andi %37, %39 : vector<1x512xi1>
    %cst_24 = arith.constant 0.000000e+00 : f32
    %55 = vector.shape_cast %54 : vector<1x512xi1> to vector<1x512xi1>
    %56 = vector.broadcast %55 : vector<1x512xi1> to vector<8x512xi1>
    %57 = vector.broadcast %cst_24 : f32 to vector<8x512xf32>
    %58 = arith.select %56, %53, %57 : vector<8x512xi1>, vector<8x512xf32>
    %c1_i32 = arith.constant 1 : i32
    %59 = tpu.dynamic_rotate %26 by %c1_i32 dim 1 : vector<8x512xf32>, i32 -> vector<8x512xf32>
    %cst_25 = arith.constant 0.000000e+00 : f32
    %60 = vector.shape_cast %35 : vector<1x512xi1> to vector<1x512xi1>
    %61 = vector.broadcast %60 : vector<1x512xi1> to vector<8x512xi1>
    %62 = vector.broadcast %cst_25 : f32 to vector<8x512xf32>
    %63 = arith.select %61, %59, %62 : vector<8x512xi1>, vector<8x512xf32>
    %c511_i32 = arith.constant 511 : i32
    %64 = tpu.dynamic_rotate %26 by %c511_i32 dim 1 : vector<8x512xf32>, i32 -> vector<8x512xf32>
    %cst_26 = arith.constant 0.000000e+00 : f32
    %65 = vector.shape_cast %37 : vector<1x512xi1> to vector<1x512xi1>
    %66 = vector.broadcast %65 : vector<1x512xi1> to vector<8x512xi1>
    %67 = vector.broadcast %cst_26 : f32 to vector<8x512xf32>
    %68 = arith.select %66, %64, %67 : vector<8x512xi1>, vector<8x512xf32>
    %c497_i32 = arith.constant 497 : i32
    %69 = tpu.dynamic_rotate %26 by %c497_i32 dim 1 : vector<8x512xf32>, i32 -> vector<8x512xf32>
    %70 = arith.andi %35, %41 : vector<1x512xi1>
    %cst_27 = arith.constant 0.000000e+00 : f32
    %71 = vector.shape_cast %70 : vector<1x512xi1> to vector<1x512xi1>
    %72 = vector.broadcast %71 : vector<1x512xi1> to vector<8x512xi1>
    %73 = vector.broadcast %cst_27 : f32 to vector<8x512xf32>
    %74 = arith.select %72, %69, %73 : vector<8x512xi1>, vector<8x512xf32>
    %c496_i32 = arith.constant 496 : i32
    %75 = tpu.dynamic_rotate %26 by %c496_i32 dim 1 : vector<8x512xf32>, i32 -> vector<8x512xf32>
    %cst_28 = arith.constant 0.000000e+00 : f32
    %76 = vector.shape_cast %41 : vector<1x512xi1> to vector<1x512xi1>
    %77 = vector.broadcast %76 : vector<1x512xi1> to vector<8x512xi1>
    %78 = vector.broadcast %cst_28 : f32 to vector<8x512xf32>
    %79 = arith.select %77, %75, %78 : vector<8x512xi1>, vector<8x512xf32>
    %c495_i32 = arith.constant 495 : i32
    %80 = tpu.dynamic_rotate %26 by %c495_i32 dim 1 : vector<8x512xf32>, i32 -> vector<8x512xf32>
    %81 = arith.andi %37, %41 : vector<1x512xi1>
    %cst_29 = arith.constant 0.000000e+00 : f32
    %82 = vector.shape_cast %81 : vector<1x512xi1> to vector<1x512xi1>
    %83 = vector.broadcast %82 : vector<1x512xi1> to vector<8x512xi1>
    %84 = vector.broadcast %cst_29 : f32 to vector<8x512xf32>
    %85 = arith.select %83, %80, %84 : vector<8x512xi1>, vector<8x512xf32>
    %86 = tpu.concatenate %47, %52, %58, %63, %26, %68, %74, %79, %85 in 0 : vector<8x512xf32>, vector<8x512xf32>, vector<8x512xf32>, vector<8x512xf32>, vector<8x512xf32>, vector<8x512xf32>, vector<8x512xf32>, vector<8x512xf32>, vector<8x512xf32> -> vector<72x512xf32>
    %87 = arith.truncf %86 : vector<72x512xf32> to vector<72x512xbf16>
    %c0_30 = arith.constant 0 : index
    %c0_31 = arith.constant 0 : index
    %88 = vector.load %arg6[%c0_30, %c0_31] : memref<6x72xbf16, #tpu.memory_space<vmem>>, vector<6x72xbf16>
    %cst_32 = arith.constant dense<0.000000e+00> : vector<6x512xf32>
    %89 = tpu.matmul %88, %87, %cst_32 {dimension_numbers = #tpu.dot_dimension_numbers<[1], [0], [0], [1], [0, 0, 1, 1], [], []>} : vector<6x72xbf16>, vector<72x512xbf16>, vector<6x512xf32> -> vector<6x512xf32>
    %c0_33 = arith.constant 0 : index
    %c0_34 = arith.constant 0 : index
    %90 = vector.load %arg7[%c0_33, %c0_34] : memref<6x1xf32, #tpu.memory_space<vmem>>, vector<6x1xf32>
    %91 = vector.broadcast %90 : vector<6x1xf32> to vector<6x512xf32>
    %92 = arith.addf %89, %91 : vector<6x512xf32>
    %cst_35 = arith.constant 0.000000e+00 : f32
    %93 = vector.broadcast %cst_35 : f32 to vector<6x512xf32>
    %94 = arith.cmpf ogt, %92, %93 : vector<6x512xf32>
    %cst_36 = arith.constant 2.000000e-01 : f32
    %95 = vector.broadcast %cst_36 : f32 to vector<6x512xf32>
    %96 = arith.mulf %95, %92 : vector<6x512xf32>
    %97 = arith.select %94, %92, %96 : vector<6x512xi1>, vector<6x512xf32>
    %c0_37 = arith.constant 0 : index
    %c0_38 = arith.constant 0 : index
    %98 = vector.load %arg8[%c0_37, %c0_38] : memref<6x4xbf16, #tpu.memory_space<vmem>>, vector<6x4xbf16>
    %cst_39 = arith.constant dense<0.000000e+00> : vector<6x512xf32>
    %99 = tpu.matmul %98, %5, %cst_39 {dimension_numbers = #tpu.dot_dimension_numbers<[1], [0], [0], [1], [0, 0, 1, 1], [], []>} : vector<6x4xbf16>, vector<4x512xbf16>, vector<6x512xf32> -> vector<6x512xf32>
    %c0_40 = arith.constant 0 : index
    %c0_41 = arith.constant 0 : index
    %100 = vector.load %arg9[%c0_40, %c0_41] : memref<6x1xf32, #tpu.memory_space<vmem>>, vector<6x1xf32>
    %101 = vector.broadcast %100 : vector<6x1xf32> to vector<6x512xf32>
    %102 = arith.addf %99, %101 : vector<6x512xf32>
    %103 = arith.addf %102, %97 : vector<6x512xf32>
    %104 = vector.extract_strided_slice %103 {offsets = [0, 0], sizes = [6, 256], strides = [1, 1]} : vector<6x512xf32> to vector<6x256xf32>
    %c0_42 = arith.constant 0 : index
    %c0_43 = arith.constant 0 : index
    %c0_44 = arith.constant 0 : index
    %105 = vector.load %arg10[%c0_42, %c0_43, %c0_44] : memref<2x6x256xf32, #tpu.memory_space<vmem>>, vector<1x6x256xf32>
    %106 = vector.shape_cast %105 : vector<1x6x256xf32> to vector<6x256xf32>
    %107 = vector.shape_cast %104 : vector<6x256xf32> to vector<1x6x256xf32>
    tpu.vector_store %arg10[%c0_42, %c0_43, %c0_44], %107 {strides = array<i32>} : memref<2x6x256xf32, #tpu.memory_space<vmem>>, vector<1x6x256xf32>,
    %108 = vector.extract_strided_slice %103 {offsets = [0, 256], sizes = [6, 256], strides = [1, 1]} : vector<6x512xf32> to vector<6x256xf32>
    %c1_45 = arith.constant 1 : index
    %c0_46 = arith.constant 0 : index
    %c0_47 = arith.constant 0 : index
    %109 = vector.load %arg10[%c1_45, %c0_46, %c0_47] : memref<2x6x256xf32, #tpu.memory_space<vmem>>, vector<1x6x256xf32>
    %110 = vector.shape_cast %109 : vector<1x6x256xf32> to vector<6x256xf32>
    %111 = vector.shape_cast %108 : vector<6x256xf32> to vector<1x6x256xf32>
    tpu.vector_store %arg10[%c1_45, %c0_46, %c0_47], %111 {strides = array<i32>} : memref<2x6x256xf32, #tpu.memory_space<vmem>>, vector<1x6x256xf32>,
    return
  }
  func.func @transform_0(%arg0: i32) -> (i32, i32, i32) {
    %c0_i32 = arith.constant 0 : i32
    %c0_i32_0 = arith.constant 0 : i32
    %c0_i32_1 = arith.constant 0 : i32
    return %arg0, %c0_i32, %c0_i32_0 : i32, i32, i32
  }
  func.func @transform_1(%arg0: i32) -> (i32, i32) {
    %c0_i32 = arith.constant 0 : i32
    %c0_i32_0 = arith.constant 0 : i32
    %c0_i32_1 = arith.constant 0 : i32
    return %c0_i32, %c0_i32_0 : i32, i32
  }
  func.func @transform_2(%arg0: i32) -> (i32, i32) {
    %c0_i32 = arith.constant 0 : i32
    %c0_i32_0 = arith.constant 0 : i32
    %c0_i32_1 = arith.constant 0 : i32
    return %c0_i32, %c0_i32_0 : i32, i32
  }
  func.func @transform_3(%arg0: i32) -> (i32, i32) {
    %c0_i32 = arith.constant 0 : i32
    %c0_i32_0 = arith.constant 0 : i32
    %c0_i32_1 = arith.constant 0 : i32
    return %c0_i32, %c0_i32_0 : i32, i32
  }
  func.func @transform_4(%arg0: i32) -> (i32, i32) {
    %c0_i32 = arith.constant 0 : i32
    %c0_i32_0 = arith.constant 0 : i32
    %c0_i32_1 = arith.constant 0 : i32
    return %c0_i32, %c0_i32_0 : i32, i32
  }
  func.func @transform_5(%arg0: i32) -> (i32, i32) {
    %c0_i32 = arith.constant 0 : i32
    %c0_i32_0 = arith.constant 0 : i32
    %c0_i32_1 = arith.constant 0 : i32
    return %c0_i32, %c0_i32_0 : i32, i32
  }
  func.func @transform_6(%arg0: i32) -> (i32, i32) {
    %c0_i32 = arith.constant 0 : i32
    %c0_i32_0 = arith.constant 0 : i32
    %c0_i32_1 = arith.constant 0 : i32
    return %c0_i32, %c0_i32_0 : i32, i32
  }
  func.func @transform_7(%arg0: i32) -> (i32, i32) {
    %c0_i32 = arith.constant 0 : i32
    %c0_i32_0 = arith.constant 0 : i32
    %c0_i32_1 = arith.constant 0 : i32
    return %c0_i32, %c0_i32_0 : i32, i32
  }
  func.func @transform_8(%arg0: i32) -> (i32, i32) {
    %c0_i32 = arith.constant 0 : i32
    %c0_i32_0 = arith.constant 0 : i32
    %c0_i32_1 = arith.constant 0 : i32
    return %c0_i32, %c0_i32_0 : i32, i32
  }
  func.func @transform_9(%arg0: i32) -> (i32, i32, i32) {
    %c0_i32 = arith.constant 0 : i32
    %c0_i32_0 = arith.constant 0 : i32
    %c0_i32_1 = arith.constant 0 : i32
    return %arg0, %c0_i32, %c0_i32_0 : i32, i32, i32
  }
}

</mosaic_0001>

<bundles_post_ra>
// kernel: tpu_custom_call.1
= control target key start
LH: loop header
LB: loop body
LE: loop exit
PB: predicated region body
PF: predicated region fallthrough
CT: control target
= control target key end

     0   :  { %s1392_s30 = smov 0   ;;  %s1878_s0 = inlined_call_operand.vmem [shape: f32[4,4,256], index: 0, kind: input, shape index: {}]   ;;  %s1879_s1 = inlined_call_operand.vmem [shape: bf16[8,4], index: 1, kind: input, shape index: {}]   ;;  %s1880_s2 = inlined_call_operand.vmem [shape: f32[8,1], index: 2, kind: input, shape index: {}]   ;;  %s1881_s3 = inlined_call_operand.vmem [shape: bf16[8,8], index: 3, kind: input, shape index: {}]   ;;  %s1882_s4 = inlined_call_operand.vmem [shape: f32[8,1], index: 4, kind: input, shape index: {}]   ;;  %s1883_s5 = inlined_call_operand.vmem [shape: bf16[6,72], index: 5, kind: input, shape index: {}]   ;;  %s1884_s6 = inlined_call_operand.vmem [shape: f32[6,1], index: 6, kind: input, shape index: {}]   ;;  %s1885_s7 = inlined_call_operand.vmem [shape: bf16[6,4], index: 7, kind: input, shape index: {}]   ;;  %s1886_s8 = inlined_call_operand.vmem [shape: f32[6,1], index: 8, kind: input, shape index: {}]   ;;  %s1887_s9 = inlined_call_operand.vmem [shape: f32[4,6,256], index: 9, kind: output, shape index: {}]  }
   0x1 LB: > { %s1140_s10 = sadd.s32 4294967295, %s1330_s30   ;;  %p1144_p0 = scmp.ge.s32.totalorder %s1330_s30, 1  ;;  %s1330_s30 = sphi %s1392_s30, %s19_s30  }
   0x2   : > { %p289_p1 = scmp.lt.s32.totalorder %s1330_s30, 3 }
   0x4   : > { %p290_p2 = pnand %p1144_p0, %p289_p1 }
   0x5   : > { %s1145_s11 = sshll.u32 (!%p290_p2), %s1140_s10, 1  ;;  %s1333_s24 = smov (!%p290_p2), 113  }
   0x6   : > { %293 = sbr.rel (%p290_p2) target bundleno = 803 (0x323), region = 56  ;;  %p328_p3 = scmp.lt.s32.totalorder (!%p290_p2), %s1145_s11, 3 }
   0x7   : > { %s1334_s25 = smov (!%p290_p2), 111   ;;  %s1335_s26 = smov (!%p290_p2), 127  }
   0x8   : > { %s1336_s27 = smov (!%p290_p2), 112   ;;  %s1337_s28 = smov (!%p290_p2), 15  }
   0x9   : > { %s1338_s29 = smov (!%p290_p2), 17   ;;  %s1339_s10 = smov (!%p290_p2), 1  }
   0xa   : > { %s1340_s14 = smov (!%p290_p2), 16  }
   0xb   : > { %v1332_v0 = vmov 0   ;;  %v356_v1 = vld [vmem:[%s1880_s2] sm:$0xff]  ;;  %s1992_s11 = smov (!%p328_p3, %s1145_s11), 3  ;;  %vm1889_vm0 = vcmask 1041408   ;;  %vm1888_vm1 = vcmask 31744   ;;  %vm1890_vm6 = vcmask 1043456  }
   0xc   : > { %411 = vmatprep.mubr.bf16.mxu0 %v1332_v0  ;;  %452 = vmatprep.mubr.bf16.mxu1 %v1332_v0  ;;  %v478_v2 = vld [vmem:[%s1882_s4] sm:$0xff]  ;;  %s1220_s16 = sshll.u32 %s1992_s11, 3  ;;  %vm484_vm7 = vcmask 64512   ;;  %s1221_s21 = sshll.u32 %s1992_s11, 4 }
   0xd   : > { %1240 = vset.pattern.permute.xlu0 %v1332_v0  ;;  %1321 = vset.pattern.permute.xlu1 %v1332_v0  ;;  %s332_s19 = scalar_lea.vmem %s1878_s0, %s1220_s16  ;;  %v355_v13 = vld [vmem:[%s1879_s1] sm:$0xf] }
   0xe   : > { %359 = vperm.xlu0 %1240, %v356_v1   ;;  %v342_v3 = vld [vmem:[%s332_s19] sm:$0xff]  ;;  %v1151_v4 = vld [vmem:[%s332_s19 + $0x8] sm:$0xff] }
   0xf   : > { %v346_v5 = vcombine.high %v342_v3, %v342_v3  ;;  %v349_v6 = vcombine.high %v1151_v4, %v1151_v4  ;;  %v351_v7 = vpack.c.bf16 %v342_v3, %v342_v3  ;;  %v353_v8 = vpack.c.bf16 %v1151_v4, %v1151_v4  ;;  %v473_v41 = vld [vmem:[%s1881_s3] sm:$0xf] }
  0x10   : > { %v865_v4 = vld [vmem:[%s1884_s6] sm:$0x3f] }
  0x11   : > { %v1416_v9 = vpack.c.bf16 %v346_v5, %v346_v5  ;;  %v1418_v10 = vpack.c.bf16 %v349_v6, %v349_v6  ;;  %v1421_v11 = vsel %vm1889_vm0, %v351_v7, 0  ;;  %v1424_v12 = vsel %vm1889_vm0, %v353_v8, 0  ;;  %v982_v5 = vld [vmem:[%s1886_s8] sm:$0x3f] }
  0x12   : > { %481 = vperm.xlu0 %1240, %v478_v2   ;;  %v595_v6 = vlaneseq }
  0x13   : > { %1152 = vmatprep.subr.msk.bf16.mxu0 %vm1889_vm0, %v1416_v9  ;;  %1154 = vmatprep.subr.msk.bf16.mxu1 %vm1889_vm0, %v1418_v10 }
  0x14   : > { %394 = vmatpush1.bf16.msra.mxu0 %v1421_v11  ;;  %435 = vmatpush1.bf16.msra.mxu1 %v1424_v12  ;;  %v1470_v7 = vand.u32 127, %v595_v6 }
  0x16   : > { %v597_v8 = vadd.s32 128, %v1470_v7  ;;  %vm823_vm14 = vcmp.lt.s32.totalorder %v1470_v7, 111 }
  0x17   : > { %1153 = vmatmul.mubr.msk.bf16.vlgmr.msra.gmra.mxu0 %vm1888_vm1, %v355_v13  ;;  %1155 = vmatmul.mubr.msk.bf16.vlgmr.msra.gmra.mxu1 %vm1888_vm1, %v355_v13  ;;  %v598_v13 = vadd.s32 256, %v1470_v7 }
  0x18   : > { %533 = vmatprep.mubr.bf16.mxu0 %v1332_v0  ;;  %574 = vmatprep.mubr.bf16.mxu1 %v1332_v0 }
  0x89   : > { %v360_v14 = vpop.permute.xlu0 %359 }
  0x8d   : > { %v482_v42 = vpop.permute.xlu0 %481 }
  0xd7   : > { %v413_v15 = vpop.f32.mrf.mxu0  ;;  %v454_v16 = vpop.f32.mrf.mxu1 }
  0xd8   : > { %v414_v17 = vadd.f32 %v413_v15, %v360_v14  ;;  %v455_v18 = vadd.f32 %v454_v16, %v360_v14  ;;  %v604_v15 = vshra.s32 %v1470_v7, 4  ;;  %v605_v16 = vshra.s32 %v597_v8, 4 }
  0xd9   : > { %v415_v19 = vpop.f32.mrf.mxu0  ;;  %v456_v20 = vpop.f32.mrf.mxu1 }
  0xda   : > { %vm461_vm2 = vcmp.gt.f32.partialorder %v414_v17, 0.0  ;;  %v465_v21 = vmul.f32 0.2, %v414_v17  ;;  %vm463_vm3 = vcmp.gt.f32.partialorder %v455_v18, 0.0  ;;  %v467_v22 = vmul.f32 0.2, %v455_v18 }
  0xdb   : > { %v416_v23 = vadd.f32 %v415_v19, %v360_v14  ;;  %v457_v24 = vadd.f32 %v456_v20, %v360_v14  ;;  %v417_v25 = vpop.f32.mrf.mxu0  ;;  %v458_v26 = vpop.f32.mrf.mxu1  ;;  %v599_v14 = vadd.s32 384, %v1470_v7  ;;  %v600_v19 = vand.u32 15, %v1470_v7 }
  0xdc   : > { %v469_v27 = vsel %vm461_vm2, %v414_v17, %v465_v21  ;;  %v471_v28 = vsel %vm463_vm3, %v455_v18, %v467_v22  ;;  %v606_v17 = vshra.s32 %v598_v13, 4  ;;  %v1477_v20 = vand.u32 15, %v604_v15 }
  0xdd   : > { %vm462_vm4 = vcmp.gt.f32.partialorder %v416_v23, 0.0  ;;  %v466_v29 = vmul.f32 0.2, %v416_v23  ;;  %v418_v30 = vpop.f32.mrf.mxu0  ;;  %v459_v31 = vpop.f32.mrf.mxu1  ;;  %v474_v32 = vpack.c.bf16 %v469_v27, %v469_v27  ;;  %vm464_vm5 = vcmp.gt.f32.partialorder %v457_v24, 0.0 }
  0xde   : > { %v468_v33 = vmul.f32 0.2, %v457_v24  ;;  %v476_v34 = vpack.c.bf16 %v471_v28, %v471_v28  ;;  %v607_v18 = vshra.s32 %v599_v14, 4  ;;  %v601_v21 = vand.u32 15, %v597_v8 }
  0xdf   : > { %v470_v35 = vsel %vm462_vm4, %v416_v23, %v466_v29  ;;  %v490_v39 = vsel %vm1890_vm6, %v474_v32, 0  ;;  %v1479_v22 = vand.u32 15, %v605_v16  ;;  %v602_v23 = vand.u32 15, %v598_v13 }
  0xe0   : > { %v475_v36 = vpack.c.bf16 %v470_v35, %v470_v35  ;;  %v472_v37 = vsel %vm464_vm5, %v457_v24, %v468_v33  ;;  %v496_v40 = vsel %vm1890_vm6, %v476_v34, 0  ;;  %v1481_v24 = vand.u32 15, %v606_v17 }
  0xe1   : > { %v477_v38 = vpack.c.bf16 %v472_v37, %v472_v37  ;;  %v603_v25 = vand.u32 15, %v599_v14  ;;  %v1483_v26 = vand.u32 15, %v607_v18  ;;  %vm1485_vm12 = vcmp.lt.s32.totalorder %v600_v19, 15 }
  0xe2   : > { %1156 = vmatprep.subr.msk.bf16.mxu0 %vm1890_vm6, %v475_v36  ;;  %vm1891_vm13 = vcmp.lt.s32.totalorder %v1477_v20, 15  ;;  %vm1493_vm15 = vcmp.lt.s32.totalorder %v601_v21, 15  ;;  %vm625_vm2 = vcmp.lt.s32.totalorder %v1479_v22, 15  ;;  %vm1502_vm4 = vcmp.lt.s32.totalorder %v602_v23, 15 }
  0xe3   : > { %1158 = vmatprep.subr.msk.bf16.mxu1 %vm1890_vm6, %v477_v38  ;;  %516 = vmatpush1.bf16.msra.mxu0 %v490_v39  ;;  %vm828_vm3 = vmand %vm1485_vm12, %vm1891_vm13  ;;  %vm1892_vm5 = vcmp.lt.s32.totalorder %v1481_v24, 15  ;;  %vm1547_vm13 = vcmp.gt.s32.totalorder %v600_v19, 0  ;;  %vm1922_vm6 = vcmp.lt.s32.totalorder %v1477_v20, 15  ;;  %vm1588_vm1 = vcmp.gt.s32.totalorder %v602_v23, 0 }
  0xe4   : > { %557 = vmatpush1.bf16.msra.mxu1 %v496_v40 }
  0xe6   : > { %1157 = vmatmul.mubr.msk.bf16.vlgmr.msra.gmra.mxu0 %vm484_vm7, %v473_v41 }
  0xe7   : > { %1159 = vmatmul.mubr.msk.bf16.vlgmr.msra.gmra.mxu1 %vm484_vm7, %v473_v41  ;;  %919 = vmatprep.mubr.bf16.mxu0 %v1332_v0  ;;  %vm1509_vm7 = vcmp.lt.s32.totalorder %v603_v25, 15 }
  0xe8   : > { %960 = vmatprep.mubr.bf16.mxu1 %v1332_v0 }
 0x1a6   : > { %v535_v43 = vpop.f32.mrf.mxu0 }
 0x1a7   : > { %v536_v44 = vadd.f32 %v535_v43, %v482_v42  ;;  %v576_v45 = vpop.f32.mrf.mxu1 }
 0x1a8   : > { %v577_v46 = vadd.f32 %v576_v45, %v482_v42  ;;  %v537_v47 = vpop.f32.mrf.mxu0  ;;  %v1916_v45 = vmov 0 }
 0x1a9   : > { %v587_v48 = vmul.f32 0.2, %v536_v44  ;;  %v538_v49 = vadd.f32 %v537_v47, %v482_v42  ;;  %v578_v50 = vpop.f32.mrf.mxu1  ;;  %vm583_vm8 = vcmp.gt.f32.partialorder %v536_v44, 0.0  ;;  %v1917_v45 = vsel %vm1547_vm13, 4294967295, %v1916_v45 }
 0x1aa   : > { %vm585_vm9 = vcmp.gt.f32.partialorder %v577_v46, 0.0  ;;  %v589_v51 = vmul.f32 0.2, %v577_v46  ;;  %v579_v52 = vadd.f32 %v578_v50, %v482_v42  ;;  %v539_v53 = vpop.f32.mrf.mxu0  ;;  %v1920_v50 = vmov 0 }
 0x1ab   : > { %vm584_vm10 = vcmp.gt.f32.partialorder %v538_v49, 0.0  ;;  %v588_v54 = vmul.f32 0.2, %v538_v49  ;;  %v580_v55 = vpop.f32.mrf.mxu1  ;;  %v1448_v58 = vsel %vm583_vm8, %v536_v44, %v587_v48  ;;  %vm1895_vm8 = vcmp.lt.s32.totalorder %v1483_v26, 15 }
 0x1ac   : > { %vm586_vm11 = vcmp.gt.f32.partialorder %v579_v52, 0.0  ;;  %v590_v56 = vmul.f32 0.2, %v579_v52  ;;  %v540_v57 = vpop.f32.mrf.mxu0  ;;  %v1450_v59 = vsel %vm585_vm9, %v577_v46, %v589_v51  ;;  %vm1520_vm9 = vmand %vm1493_vm15, %vm625_vm2 }
 0x1ad   : > { %v1452_v60 = vsel %vm584_vm10, %v538_v49, %v588_v54  ;;  %v581_v61 = vpop.f32.mrf.mxu1  ;;  %vm1524_vm10 = vcmp.gt.s32.totalorder %v601_v21, 0  ;;  %vm1541_vm0 = vmand %vm1509_vm7, %vm1895_vm8 }
 0x1ae   : > { %v1251_v62 = vpack.i.bf16 %v1450_v59, %v1452_v60  ;;  %v1241_v63 = vpack.i.bf16 %v1452_v60, %v1448_v58  ;;  %v1458_v1 = vsel %vm586_vm11, %v579_v52, %v590_v56  ;;  %vm1532_vm11 = vmand %vm1502_vm4, %vm1892_vm5 }
 0x1af   : > { %v1261_v2 = vpack.i.bf16 %v1458_v1, %v1448_v58  ;;  %v1246_v3 = vpack.i.bf16 %v1458_v1, %v1450_v59  ;;  %vm1559_vm5 = vmand %vm1524_vm10, %vm625_vm2 }
 0x1b0   : > { %1252 = vrot.lane.b32.xlu0 %v1251_v62, %s1333_s24  ;;  %1242 = vrot.lane.b32.xlu1 %v1241_v63, %s1334_s25 }
 0x1b4   : > { %1262 = vrot.lane.b32.xlu0 %v1261_v2, %s1333_s24  ;;  %1247 = vrot.lane.b32.xlu1 %v1246_v3, %s1334_s25  ;;  %s339_s24 = scalar_lea.vmem %s1887_s9, %s1221_s21 }
 0x1b8   : > { %1272 = vrot.lane.b32.xlu0 %v1251_v62, %s1335_s26  ;;  %1257 = vrot.lane.b32.xlu1 %v1251_v62, %s1336_s27 }
 0x1bc   : > { %1282 = vrot.lane.b32.xlu0 %v1241_v63, %s1337_s28  ;;  %1267 = vrot.lane.b32.xlu1 %v1261_v2, %s1336_s27 }
 0x1c0   : > { %1292 = vrot.lane.b32.xlu0 %v1246_v3, %s1337_s28  ;;  %1277 = vrot.lane.b32.xlu1 %v1261_v2, %s1335_s26  ;;  %v1925_v2 = vmov 0 }
 0x1c1   : > { %v1926_v2 = vsel %vm1588_vm1, 4294967295, %v1925_v2 }
 0x1c4   : > { %1302 = vrot.lane.b32.xlu0 %v1241_v63, %s1338_s29  ;;  %1287 = vrot.lane.b32.xlu1 %v1241_v63, %s1339_s10 }
 0x1c8   : > { %1312 = vrot.lane.b32.xlu0 %v1246_v3, %s1338_s29  ;;  %1297 = vrot.lane.b32.xlu1 %v1246_v3, %s1339_s10 }
 0x1cc   : > { %868 = vperm.xlu0 %1240, %v865_v4   ;;  %1307 = vrot.lane.b32.xlu1 %v1241_v63, %s1340_s14 }
 0x1d0   : > { %1317 = vrot.lane.b32.xlu1 %v1246_v3, %s1340_s14 }
 0x1d4   : > { %985 = vperm.xlu1 %1321, %v982_v5  }
 0x222   : > { %v1490_v28 = vpop.permute.xlu0 %1252  ;;  %v1243_v29 = vpop.permute.xlu1 %1242 }
 0x223   : > { %v1245_v30 = vunpack.i.h.bf16 %v1243_v29  ;;  %v1244_v31 = vunpack.i.l.bf16 %v1243_v29  ;;  %v1255_v46 = vunpack.i.h.bf16 %v1490_v28  ;;  %v1254_v47 = vunpack.i.l.bf16 %v1490_v28 }
 0x225   : > { %v826_v34 = vsel %vm823_vm14, %v1244_v31, %v1245_v30 }
 0x226   : > { %v1514_v36 = vpop.permute.xlu0 %1262  ;;  %v1248_v38 = vpop.permute.xlu1 %1247  ;;  %v840_v42 = vsel %vm828_vm3, %v826_v34, 0.0  ;;  %vm1563_vm3 = vcmp.gt.s32.totalorder %v603_v25, 0 }
 0x227   : > { %v1250_v40 = vunpack.i.h.bf16 %v1248_v38  ;;  %v1249_v41 = vunpack.i.l.bf16 %v1248_v38  ;;  %v1921_v50 = vsel %vm1563_vm3, 4294967295, %v1920_v50  ;;  %v860_v55 = vpack.c.bf16 %v840_v42, %v840_v42 }
 0x228   : > { %v1265_v57 = vunpack.i.h.bf16 %v1514_v36  ;;  %v1264_v13 = vunpack.i.l.bf16 %v1514_v36 }
 0x229   : > { %v824_v48 = vsel %vm823_vm14, %v1249_v41, %v1250_v40  ;;  %v825_v51 = vsel %vm823_vm14, %v1245_v30, %v1249_v41  ;;  %v827_v52 = vsel %vm823_vm14, %v1250_v40, %v1244_v31  ;;  %vm1584_vm14 = vmand %vm1547_vm13, %vm1922_vm6 }
 0x22a   : > { %v1571_v53 = vpop.permute.xlu0 %1272  ;;  %v1258_v54 = vpop.permute.xlu1 %1257  ;;  %v842_v56 = vsel %vm1532_vm11, %v824_v48, 0.0  ;;  %v841_v61 = vsel %vm1520_vm9, %v825_v51, 0.0  ;;  %v843_v62 = vsel %vm1541_vm0, %v827_v52, 0.0  ;;  %vm1596_vm0 = vmpackc.low %vm625_vm2, %vm1559_vm5  ;;  %vm1931_vm2 = vcmp.lt.s32.totalorder %v1470_v7, 113 }
 0x22b   : > { %v1260_v3 = vunpack.i.h.bf16 %v1258_v54  ;;  %v1259_v4 = vunpack.i.l.bf16 %v1258_v54  ;;  %v861_v5 = vpack.c.bf16 %v841_v61, %v841_v61  ;;  %v863_v6 = vpack.c.bf16 %v843_v62, %v843_v62  ;;  %vm1607_vm6 = vmand %vm1563_vm3, %vm1895_vm8 }
 0x22c   : > { %v1275_v14 = vunpack.i.h.bf16 %v1571_v53  ;;  %v1274_v15 = vunpack.i.l.bf16 %v1571_v53  ;;  %v862_v16 = vpack.c.bf16 %v842_v56, %v842_v56  ;;  %v771_v18 = vsel %vm1931_vm2, %v1254_v47, %v1255_v46 }
 0x22d   : > { %vm1932_vm5 = vcmp.lt.s32.totalorder %v1470_v7, 112  ;;  %vm1933_vm9 = vcmask 1043456   ;;  %vm1936_vm8 = vcmp.lt.s32.totalorder %v1477_v20, 15  ;;  %vm1939_vm2 = vcmp.lt.s32.totalorder %v1481_v24, 15 }
 0x22e   : > { %v800_v19 = vsel %vm1932_vm5, %v1259_v4, %v1260_v3  ;;  %1160 = vmatprep.subr.msk.bf16.mxu0 %vm1933_vm9, %v861_v5  ;;  %vm1934_vm11 = vmmov %vm1933_vm9  ;;  %v1617_v21 = vpop.permute.xlu0 %1282  ;;  %v1268_v23 = vpop.permute.xlu1 %1267  ;;  %v882_v37 = vsel %vm1933_vm9, %v862_v16, 0 }
 0x22f   : > { %1186 = vmatprep.subr.msk.bf16.mxu1 %vm1934_vm11, %v863_v6  ;;  %vm1935_vm13 = vmmov %vm1933_vm9  ;;  %v1162_v29 = vpack.c.bf16 %v800_v19, %v771_v18  ;;  %v1270_v30 = vunpack.i.h.bf16 %v1268_v23  ;;  %v1269_v36 = vunpack.i.l.bf16 %v1268_v23  ;;  %v1285_v63 = vunpack.i.h.bf16 %v1617_v21 }
 0x230   : > { %v876_v25 = vsel %vm1935_vm13, %v860_v55, 0  ;;  %vm1624_vm3 = vmpackc.low %vm1936_vm8, %vm1584_vm14  ;;  %vm1942_vm13 = vcmp.lt.s32.totalorder %v1470_v7, 113  ;;  %vm1943_vm8 = vcmp.lt.s32.totalorder %v1483_v26, 15  ;;  %935 = vmatpush1.bf16.msra.mxu1 %v882_v37 }
 0x231   : > { %894 = vmatpush1.bf16.msra.mxu0 %v876_v25  ;;  %vm1632_vm5 = vmand %vm1588_vm1, %vm1939_vm2  ;;  %v770_v34 = vsel %vm1942_vm13, %v1255_v46, %v1265_v57  ;;  %vm1947_vm2 = vcmp.lt.s32.totalorder %v1470_v7, 127  ;;  %vm1948_vm1 = vcmp.lt.s32.totalorder %v1470_v7, 112 }
 0x232   : > { %vm1643_vm14 = vmpackc.low %vm1943_vm8, %vm1607_vm6  ;;  %v746_v41 = vsel %vm1947_vm2, %v1274_v15, %v1275_v14  ;;  %v799_v42 = vsel %vm1948_vm1, %v1260_v3, %v1270_v30  ;;  %1163 = vmatprep.subr.msk.bf16.mxu0 %vm1596_vm0, %v1162_v29  ;;  %v1293_v49 = vpop.permute.xlu0 %1292  ;;  %v1278_v51 = vpop.permute.xlu1 %1277  ;;  %vm1953_vm0 = vcmp.lt.s32.totalorder %v1481_v24, 15  ;;  %v1284_v3 = vunpack.i.l.bf16 %v1617_v21 }
 0x233   : > { %vm1946_vm11 = vmmov %vm1942_vm13  ;;  %vm1341_vm13 = vmmov 1   ;;  %v1191_v48 = vpack.c.bf16 %v799_v42, %v770_v34  ;;  %v1168_v56 = vpack.c.bf16 %v746_v41, %v1452_v60  ;;  %v1279_v61 = vunpack.i.l.bf16 %v1278_v51 }
 0x234   : > { %v772_v40 = vsel %vm1946_vm11, %v1264_v13, %v1254_v47  ;;  %vm1658_vm6 = vmpackc.low %vm1493_vm15, %vm1341_vm13  ;;  %v802_v47 = vsel %vm1948_vm1, %v1270_v30, %v1269_v36  ;;  %v1295_v32 = vunpack.i.h.bf16 %v1293_v49  ;;  %v1294_v19 = vunpack.i.l.bf16 %v1293_v49 }
 0x235   : > { %vm1951_vm9 = vmmov %vm1946_vm11 }
 0x236   : > { %v773_v44 = vsel %vm1951_vm9, %v1265_v57, %v1264_v13  ;;  %vm1952_vm8 = vmmov %vm1948_vm1  ;;  %v1280_v57 = vunpack.i.h.bf16 %v1278_v51  ;;  %vm1962_vm1 = vcmp.lt.s32.totalorder %v1470_v7, 127  ;;  %v1288_v8 = vpop.permute.xlu1 %1287  ;;  %v1729_v17 = vpop.permute.xlu0 %1302 }
 0x237   : > { %v801_v46 = vsel %vm1952_vm8, %v1269_v36, %v1259_v4  ;;  %vm1672_vm11 = vmpackc.low %vm1953_vm0, %vm1632_vm5  ;;  %v1188_v54 = vpack.c.bf16 %v802_v47, %v773_v44  ;;  %vm719_vm0 = vcmp.lt.s32.totalorder %v1470_v7, 1  ;;  %v1290_v21 = vunpack.i.h.bf16 %v1288_v8 }
 0x238   : > { %v1165_v53 = vpack.c.bf16 %v801_v46, %v772_v40  ;;  %vm1679_vm2 = vmpackc.low %vm1485_vm12, %vm1341_vm13  ;;  %v745_v4 = vsel %vm1962_vm1, %v1275_v14, %v1280_v57  ;;  %v1305_v34 = vunpack.i.h.bf16 %v1729_v17  ;;  %v1304_v36 = vunpack.i.l.bf16 %v1729_v17 }
 0x239   : > { %vm1688_vm5 = vmpackc.low %vm1509_vm7, %vm1341_vm13  ;;  %1189 = vmatprep.subr.msk.bf16.mxu1 %vm1643_vm14, %v1188_v54  ;;  %vm1965_vm14 = vcmp.gt.s32.totalorder %v1479_v22, 0  ;;  %v1197_v14 = vpack.c.bf16 %v745_v4, %v1450_v59  ;;  %v1289_v59 = vunpack.i.l.bf16 %v1288_v8 }
 0x23a   : > { %1166 = vmatpush1.bf16.msk.msra.mxu0 %vm1624_vm3, %v1165_v53  ;;  %vm1703_vm9 = vmpackc.low %vm1502_vm4, %vm1341_vm13  ;;  %1192 = vmatpush1.bf16.msk.msra.mxu1 %vm1672_vm11, %v1191_v48  ;;  %v1298_v27 = vpop.permute.xlu1 %1297  ;;  %v1313_v37 = vpop.permute.xlu0 %1312 }
 0x23b   : > { %vm1963_vm8 = vmmov %vm1962_vm1  ;;  %1169 = vmatprep.subr.msk.bf16.mxu0 %vm1658_vm6, %v1168_v56  ;;  %vm1968_vm6 = vcmp.gt.s32.totalorder %v1477_v20, 0  ;;  %v1300_v25 = vunpack.i.h.bf16 %v1298_v27  ;;  %v1299_v30 = vunpack.i.l.bf16 %v1298_v27  ;;  %v1315_v49 = vunpack.i.h.bf16 %v1313_v37 }
 0x23c   : > { %v747_v5 = vsel %vm1963_vm8, %v1279_v61, %v1274_v15  ;;  %vm1964_vm3 = vmmov %vm1962_vm1  ;;  %vm622_vm8 = vcmp.gt.s32.totalorder %v1481_v24, 0  ;;  %vm1971_vm1 = vcmp.lt.s32.totalorder %v1470_v7, 15  ;;  %v1314_v51 = vunpack.i.l.bf16 %v1313_v37 }
 0x23d   : > { %v748_v6 = vsel %vm1964_vm3, %v1280_v57, %v1279_v61  ;;  %vm1722_vm13 = vmand %vm1493_vm15, %vm1965_vm14  ;;  %v1171_v15 = vpack.c.bf16 %v747_v5, %v1448_v58  ;;  %vm623_vm15 = vcmp.gt.s32.totalorder %v1483_v26, 0  ;;  %v693_v58 = vsel %vm1971_vm1, %v1284_v3, %v1285_v63 }
 0x23e   : > { %v1194_v16 = vpack.c.bf16 %v748_v6, %v1458_v1  ;;  %vm1735_vm11 = vmand %vm1485_vm12, %vm1968_vm6  ;;  %v722_v1 = vsel %vm719_vm0, %v1289_v59, %v1290_v21  ;;  %vm665_vm6 = vcmp.lt.s32.totalorder %v1470_v7, 16  ;;  %v723_v38 = vsel %vm719_vm0, %v1300_v25, %v1289_v59  ;;  %v1308_v44 = vpop.permute.xlu1 %1307 }
 0x23f   : > { %1172 = vmatpush1.bf16.msk.msra.mxu0 %vm1679_vm2, %v1171_v15  ;;  %vm1173_vm12 = vmpackc.low %vm1524_vm10, %vm1722_vm13  ;;  %vm1972_vm2 = vnez %v1917_v45  ;;  %v1174_v23 = vpack.c.bf16 %v722_v1, %v693_v58  ;;  %v720_v41 = vsel %vm719_vm0, %v1299_v30, %v1300_v25  ;;  %v721_v42 = vsel %vm719_vm0, %v1290_v21, %v1299_v30 }
 0x240   : > { %1195 = vmatprep.subr.msk.bf16.mxu1 %vm1688_vm5, %v1194_v16  ;;  %vm1176_vm5 = vmpackc.low %vm1972_vm2, %vm1735_vm11  ;;  %vm1982_vm13 = vnez %v1921_v50  ;;  %v1310_v47 = vunpack.i.h.bf16 %v1308_v44  ;;  %v1309_v48 = vunpack.i.l.bf16 %v1308_v44  ;;  %vm1984_vm0 = vcmp.gt.s32.totalorder %v1479_v22, 0 }
 0x241   : > { %1198 = vmatpush1.bf16.msk.msra.mxu1 %vm1703_vm9, %v1197_v14  ;;  %vm1763_vm3 = vmand %vm1509_vm7, %vm623_vm15  ;;  %vm636_vm9 = vcmp.lt.s32.totalorder %v1470_v7, 17  ;;  %1175 = vmatprep.subr.msk.bf16.mxu0 %vm1173_vm12, %v1174_v23  ;;  %v981_v7 = vld [vmem:[%s1885_s7] sm:$0x7] }
 0x242   : > { %vm1975_vm14 = vmmov %vm1971_vm1  ;;  %v639_v52 = vsel %vm636_vm9, %v1304_v36, %v1305_v34  ;;  %v668_v53 = vsel %vm665_vm6, %v1309_v48, %v1310_v47  ;;  %v1318_v55 = vpop.permute.xlu1 %1317  ;;  %v637_v57 = vsel %vm636_vm9, %v1314_v51, %v1315_v49  ;;  %v638_v45 = vsel %vm636_vm9, %v1305_v34, %v1314_v51 }
 0x243   : > { %v691_v29 = vsel %vm1975_vm14, %v1294_v19, %v1295_v32  ;;  %vm1775_vm1 = vmand %vm1502_vm4, %vm622_vm8  ;;  %vm1979_vm4 = vcmp.gt.s32.totalorder %v1479_v22, 0  ;;  %v1180_v54 = vpack.c.bf16 %v668_v53, %v639_v52  ;;  %v1320_v22 = vunpack.i.h.bf16 %v1318_v55 }
 0x244   : > { %vm1978_vm7 = vmmov %vm1975_vm14  ;;  %v1200_v39 = vpack.c.bf16 %v720_v41, %v691_v29  ;;  %v1319_v56 = vunpack.i.l.bf16 %v1318_v55  ;;  %v640_v50 = vsel %vm636_vm9, %v1315_v49, %v1304_v36  ;;  %vm871_vm9 = vcmask 588800  }
 0x245   : > { %v694_v35 = vsel %vm1978_vm7, %v1295_v32, %v1284_v3  ;;  %vm1794_vm14 = vmand %vm1524_vm10, %vm1979_vm4  ;;  %v692_v40 = vsel %vm1978_vm7, %v1285_v63, %v1294_v19  ;;  %vm1983_vm10 = vnez %v1926_v2  ;;  %v669_v62 = vsel %vm665_vm6, %v1320_v22, %v1309_v48 }
 0x246   : > { %v1177_v43 = vpack.c.bf16 %v723_v38, %v694_v35  ;;  %vm1199_vm12 = vmpackc.low %vm1982_vm13, %vm1763_vm3  ;;  %v1203_v46 = vpack.c.bf16 %v721_v42, %v692_v40  ;;  %v666_v61 = vsel %vm665_vm6, %v1319_v56, %v1320_v22  ;;  %v667_v2 = vsel %vm665_vm6, %v1310_v47, %v1319_v56 }
 0x247   : > { %vm1202_vm4 = vmpackc.low %vm1983_vm10, %vm1775_vm1  ;;  %1201 = vmatprep.subr.msk.bf16.mxu1 %vm1199_vm12, %v1200_v39  ;;  %vm1985_vm1 = vcmp.gt.s32.totalorder %v1477_v20, 0  ;;  %v1183_v63 = vpack.c.bf16 %v669_v62, %v640_v50  ;;  %v1206_v60 = vpack.c.bf16 %v666_v61, %v637_v57  ;;  %v1209_v3 = vpack.c.bf16 %v667_v2, %v638_v45  ;;  %v864_v20 = vld [vmem:[%s1883_s5] sm:$0x7] }
 0x248   : > { %1178 = vmatpush1.bf16.msk.msra.mxu0 %vm1176_vm5, %v1177_v43  ;;  %vm1179_vm3 = vmpackc.low %vm1984_vm0, %vm1794_vm14  ;;  %1204 = vmatpush1.bf16.msk.msra.mxu1 %vm1202_vm4, %v1203_v46 }
 0x249   : > { %vm641_vm7 = vmand %vm1972_vm2, %vm1985_vm1  ;;  %1181 = vmatprep.subr.msk.bf16.mxu0 %vm1179_vm3, %v1180_v54 }
 0x24a   : > { %vm644_vm11 = vmand %vm1982_vm13, %vm623_vm15 }
 0x24b   : > { %vm643_vm5 = vmand %vm1983_vm10, %vm622_vm8  ;;  %vm1987_vm10 = vcmask 1041408  }
 0x24c   : > { %vm1986_vm2 = vmmov %vm1985_vm1 }
 0x24d   : > { %vm1182_vm14 = vmpackc.low %vm1986_vm2, %vm641_vm7 }
 0x24e   : > { %vm1205_vm13 = vmpackc.low %vm623_vm15, %vm644_vm11  ;;  %1184 = vmatpush1.bf16.msk.msra.mxu0 %vm1182_vm14, %v1183_v63  ;;  %vm1989_vm15 = vcmask 31744  }
 0x24f   : > { %vm1208_vm12 = vmpackc.low %vm622_vm8, %vm643_vm5  ;;  %1207 = vmatprep.subr.msk.bf16.mxu1 %vm1205_vm13, %v1206_v60  ;;  %1212 = vmatprep.subr.msk.bf16.mxu0 %vm1987_vm10, %v1416_v9  ;;  %v986_v15 = vpop.permute.xlu1 %985 }
 0x250   : > { %1210 = vmatpush1.bf16.msk.msra.mxu1 %vm1208_vm12, %v1209_v3  ;;  %vm1988_vm6 = vmmov %vm1987_vm10 }
 0x251   : > { %1214 = vmatprep.subr.msk.bf16.mxu1 %vm1988_vm6, %v1418_v10  ;;  %1185 = vmatmul.mubr.msk.bf16.vlgmr.msra.gmra.mxu0 %vm871_vm9, %v864_v20  ;;  %vm1990_vm8 = vmmov %vm1989_vm15  ;;  %v869_v10 = vpop.permute.xlu0 %868 }
 0x252   : > { %1006 = vmatpush1.bf16.msra.mxu0 %v1421_v11  ;;  %1023 = vmatprep.mubr.bf16.mxu0 %v1332_v0 }
 0x253   : > { %1211 = vmatmul.mubr.msk.bf16.vlgmr.msra.gmra.mxu1 %vm871_vm9, %v864_v20 }
 0x254   : > { %1047 = vmatpush1.bf16.msra.mxu1 %v1424_v12  ;;  %1064 = vmatprep.mubr.bf16.mxu1 %v1332_v0 }
 0x259   : > { %1213 = vmatmul.mubr.msk.bf16.vlgmr.msra.gmra.mxu0 %vm1989_vm15, %v981_v7 }
 0x25b   : > { %1215 = vmatmul.mubr.msk.bf16.vlgmr.msra.gmra.mxu1 %vm1990_vm8, %v981_v7 }
 0x311   : > { %v921_v9 = vpop.f32.mrf.mxu0 }
 0x312   : > { %v922_v26 = vadd.f32 %v921_v9, %v869_v10 }
 0x313   : > { %v962_v24 = vpop.f32.mrf.mxu1  ;;  %v923_v11 = vpop.f32.mrf.mxu0 }
 0x314   : > { %v963_v4 = vadd.f32 %v962_v24, %v869_v10  ;;  %v924_v5 = vadd.f32 %v923_v11, %v869_v10  ;;  %v973_v13 = vmul.f32 0.2, %v922_v26  ;;  %vm969_vm4 = vcmp.gt.f32.partialorder %v922_v26, 0.0 }
 0x315   : > { %v964_v12 = vpop.f32.mrf.mxu1  ;;  %v925_v6 = vpop.f32.mrf.mxu0 }
 0x316   : > { %v965_v8 = vadd.f32 %v964_v12, %v869_v10  ;;  %v975_v16 = vmul.f32 0.2, %v963_v4  ;;  %vm971_vm0 = vcmp.gt.f32.partialorder %v963_v4, 0.0  ;;  %v974_v18 = vmul.f32 0.2, %v924_v5 }
 0x317   : > { %v966_v0 = vpop.f32.mrf.mxu1  ;;  %v926_v14 = vpop.f32.mrf.mxu0  ;;  %vm970_vm3 = vcmp.gt.f32.partialorder %v924_v5, 0.0  ;;  %v977_v58 = vsel %vm969_vm4, %v922_v26, %v973_v13 }
 0x318   : > { %v976_v19 = vmul.f32 0.2, %v965_v8  ;;  %vm972_vm1 = vcmp.gt.f32.partialorder %v965_v8, 0.0  ;;  %v979_v25 = vsel %vm971_vm0, %v963_v4, %v975_v16  ;;  %v978_v31 = vsel %vm970_vm3, %v924_v5, %v974_v18 }
 0x319   : > { %v967_v17 = vpop.f32.mrf.mxu1  ;;  %v1025_v32 = vpop.f32.mrf.mxu0 }
 0x31a   : > { %v1026_v21 = vadd.f32 %v1025_v32, %v986_v15  ;;  %v980_v37 = vsel %vm972_vm1, %v965_v8, %v976_v19 }
 0x31b   : > { %v1066_v59 = vpop.f32.mrf.mxu1  ;;  %v1027_v27 = vpop.f32.mrf.mxu0 }
 0x31c   : > { %v1067_v1 = vadd.f32 %v1066_v59, %v986_v15  ;;  %v1073_v23 = vadd.f32 %v1026_v21, %v977_v58  ;;  %v1028_v28 = vadd.f32 %v1027_v27, %v986_v15 }
 0x31d   : > { %v1068_v29 = vpop.f32.mrf.mxu1  ;;  %v1029_v34 = vpop.f32.mrf.mxu0 }
 0x31e   : > { %v1075_v30 = vadd.f32 %v1067_v1, %v979_v25  ;;  %v1069_v35 = vadd.f32 %v1068_v29, %v986_v15  ;;  %1077 = vst [vmem:[%s339_s24] sm:$0x3f] %v1073_v23  ;;  %v1074_v36 = vadd.f32 %v1028_v28, %v978_v31 }
 0x31f   : > { %v1070_v38 = vpop.f32.mrf.mxu1  ;;  %v1030_v40 = vpop.f32.mrf.mxu0 }
 0x320   : > { %1216 = vst [vmem:[%s339_s24 + $0x10] sm:$0x3f] %v1075_v30  ;;  %v1076_v33 = vadd.f32 %v1069_v35, %v980_v37  ;;  %1078 = vst [vmem:[%s339_s24 + $0x8] sm:$0x3f] %v1074_v36 }
 0x321   : > { %v1071_v41 = vpop.f32.mrf.mxu1 }
 0x322   : > { %1217 = vst [vmem:[%s339_s24 + $0x18] sm:$0x3f] %v1076_v33 }
 0x323 PF: > { %s19_s30 = sadd.s32 1, %s1330_s30  }
 0x324   : > { %p16_p4 = scmp.ge.s32.totalorder %s19_s30, 4  }
 0x326   :  { %18 = sbr.rel (!%p16_p4) target bundleno = 1 (0x1), region = 88 }

</bundles_post_ra>
